<compile_context>
chip_gen: v7x
topology: tpu7x:2x2x1
jax: 0.10.0
libtpu: 0.0.40
codegen_flags: <defaults>
</compile_context>

<pallas_src>
import functools

import jax
import jax.numpy as jnp
from jax.experimental import pallas as pl
from jax.experimental.pallas import tpu as pltpu


# ----------------------------------------------------------------------------
# Kernel: elementwise sin(omega * x) on one (TILE_ROWS, LANE) VMEM tile.
# omega is a static module attribute, baked in at trace time.
# ----------------------------------------------------------------------------
def _sine_kernel(x_ref, o_ref, *, omega: float):
    x = x_ref[...]
    # Compute in f32 regardless of storage dtype (precision for omega~30 with
    # bf16 inputs; HBM traffic stays at the narrow dtype).
    y = jnp.sin(jnp.float32(omega) * x.astype(jnp.float32))
    o_ref[...] = y.astype(o_ref.dtype)


def sine_pallas(x: jax.Array, omega: float) -> jax.Array:
    """Elementwise sin(omega * x) for arbitrarily-shaped x via a tiled Pallas kernel."""
    orig_shape = x.shape
    dtype = x.dtype
    n = x.size
    if n == 0:
        return x

    itemsize = jnp.dtype(dtype).itemsize

    # --- Lane-dense layout ---------------------------------------------------
    # Fast path: widest lane width (multiple of 128) that divides n exactly
    # -> zero-copy (no pad, no tail slice).
    LANE = None
    for cand in (1024, 512, 256, 128):
        if n % cand == 0:
            LANE = cand
            break

    xf = x.reshape(-1)
    padded = False
    if LANE is None:
        # Rare ragged case: pad the flat vector up to a multiple of 128 lanes.
        LANE = 128
        pad_to = pl.cdiv(n, LANE) * LANE
        xf = jnp.pad(xf, (0, pad_to - n))
        padded = True

    rows = xf.size // LANE
    x2 = xf.reshape(rows, LANE)

    # --- Tiling: ~4 MiB blocks, rows a multiple of 8 (or the full array) -----
    target_bytes = 4 << 20
    tile_rows = max(8, (target_bytes // (LANE * itemsize)) // 8 * 8)
    TILE_ROWS = min(tile_rows, rows)          # if < 8, block == full array (OK)
    grid = (pl.cdiv(rows, TILE_ROWS),)        # Pallas masks the ragged last block

    kernel = functools.partial(_sine_kernel, omega=float(omega))
    cost = pl.CostEstimate(
        flops=n,                               # the omega*x multiply
        transcendentals=n,                     # one sin per element
        bytes_accessed=2 * n * itemsize,       # read + write
    )

    out2 = pl.pallas_call(
        kernel,
        out_shape=jax.ShapeDtypeStruct((rows, LANE), dtype),
        grid=grid,
        in_specs=[pl.BlockSpec((TILE_ROWS, LANE), lambda i: (i, 0))],
        out_specs=pl.BlockSpec((TILE_ROWS, LANE), lambda i: (i, 0)),
        compiler_params=pltpu.CompilerParams(
            dimension_semantics=("parallel",),
            vmem_limit_bytes=32 << 20,
        ),
        cost_estimate=cost,
    )(x2)

    if padded:
        return out2.reshape(-1)[:n].reshape(orig_shape)
    return out2.reshape(orig_shape)


# Plain-JAX reference for the correctness check.
def sine_ref(x: jax.Array, omega: float) -> jax.Array:
    return jnp.sin(omega * x)


if __name__ == "__main__":
    key = jax.random.PRNGKey(0)
    omega = 30.0  # typical SIREN frequency scaling

    # Primary shape consistent with the module spec: (N, *) -> same shape out.
    # 2*4*16*16 = 2048 elements -> zero-copy fast path (multiple of 1024 lanes).
    k1, k2 = jax.random.split(key)
    x = jax.random.normal(k1, (2, 4, 16, 16), dtype=jnp.float32)
    out = jax.block_until_ready(sine_pallas(x, omega))
    assert out.shape == x.shape
    assert jnp.allclose(out, sine_ref(x, omega), atol=1e-5, rtol=1e-5)

    # Ragged size to exercise the padded fallback path.
    x_odd = jax.random.normal(k2, (3, 7, 5), dtype=jnp.float32)
    out_odd = jax.block_until_ready(sine_pallas(x_odd, omega))
    assert out_odd.shape == x_odd.shape
    assert jnp.allclose(out_odd, sine_ref(x_odd, omega), atol=1e-5, rtol=1e-5)

    print("KERNEL_OK")
</pallas_src>

<mosaic_0001>
module attributes {stable_mosaic.version = 11 : i64} {
  func.func @_sine_kernel(%arg0: i32, %arg1: memref<2x1024xf32, #tpu.memory_space<vmem>>, %arg2: memref<2x1024xf32, #tpu.memory_space<vmem>>) attributes {dimension_semantics = [#tpu.dimension_semantics<parallel>], iteration_bounds = array<i64: 1>, scalar_prefetch = 0 : i64, scratch_operands = 0 : i64, tpu.core_type = #tpu.core_type<tc>, window_params = [{transform_indices = @transform_0, window_bounds = array<i64: 2, 1024>}, {transform_indices = @transform_1, window_bounds = array<i64: 2, 1024>}]} {
    %c0 = arith.constant 0 : index
    %c0_0 = arith.constant 0 : index
    %0 = vector.load %arg1[%c0, %c0_0] : memref<2x1024xf32, #tpu.memory_space<vmem>>, vector<2x1024xf32>
    %cst = arith.constant 3.000000e+01 : f32
    %1 = vector.broadcast %cst : f32 to vector<2x1024xf32>
    %2 = arith.mulf %1, %0 : vector<2x1024xf32>
    %3 = math.sin %2 : vector<2x1024xf32>
    %c0_1 = arith.constant 0 : index
    %c0_2 = arith.constant 0 : index
    %4 = vector.load %arg2[%c0_1, %c0_2] : memref<2x1024xf32, #tpu.memory_space<vmem>>, vector<2x1024xf32>
    tpu.vector_store %arg2[%c0_1, %c0_2], %3 {strides = array<i32>} : memref<2x1024xf32, #tpu.memory_space<vmem>>, vector<2x1024xf32>,
    return
  }
  func.func @transform_0(%arg0: i32) -> (i32, i32) {
    %c0_i32 = arith.constant 0 : i32
    %c0_i32_0 = arith.constant 0 : i32
    return %arg0, %c0_i32 : i32, i32
  }
  func.func @transform_1(%arg0: i32) -> (i32, i32) {
    %c0_i32 = arith.constant 0 : i32
    %c0_i32_0 = arith.constant 0 : i32
    return %arg0, %c0_i32 : i32, i32
  }
}

</mosaic_0001>

<bundles_post_ra>
// kernel: tpu_custom_call.1
= control target key start
LH: loop header
LB: loop body
LE: loop exit
PB: predicated region body
PF: predicated region fallthrough
CT: control target
= control target key end

     0   :  { %6 = vsyncpa [#allocation3], 0  ;;  %s442_s0 = inlined_call_operand.hbm [shape: f32[2,1024], index: 0, kind: input, shape index: {}]   ;;  %s443_s1 = inlined_call_operand.hbm [shape: f32[2,1024], index: 1, kind: output, shape index: {}]  }
   0x1   :  { %7 = vsyncpa [#allocation4], 0  ;;  %s330_s6 = smov [#allocation2]   ;;  %s282_s10 = scalar_lea.hbm %s442_s0, 256 }
   0x2   :  { %s14_s7 = sshll.u32 %s330_s6, 4  ;;  %p283_p0 = scmp.ne.s32.totalorder %s442_s0, %s282_s10  ;;  %s15_s7 = int_to_ptr.vmem [resolvable:$true] %s14_s7 }
   0x3   :  { %p286_p1 = scmp.lt.u32.totalorder %s282_s10, %s442_s0 }
   0x5   :  { %p288_p2 = pnand %p286_p1, %p283_p0 }
   0x7   :  { %291 = shalt.err (!%p288_p2)
}
   0x8   :  { %s292_s15 = scalar_lea.vmem %s15_s7, 256  ;;  %p297_p4 = scmp.lt.s32.totalorder %s15_s7, %s15_s7 }
   0x9   :  { %p293_p3 = scmp.ne.s32.totalorder %s15_s7, %s292_s15  ;;  %p298_p5 = scmp.lt.s32.totalorder %s292_s15, %s292_s15 }
   0xb   :  { %p299_p6 = por %p298_p5, %p297_p4 }
   0xd   :  { %p300_p7 = pnand %p299_p6, %p293_p3 }
   0xf   :  { %303 = shalt.err (!%p300_p7)
}
  0x10   :  { %17 = dma.hbm_to_vmem [thread:$0]  %s442_s0, 256, %s15_s7, [#allocation3]  }
  0x11   :  { %326 = dma.done.wait [#allocation3], 256  }
  0x12   :  { %327 = vsyncadd [#allocation3], 4294967040  ;;  %v21_v0 = vld [vmem:[#allocation2] sm:$0xff]  ;;  %v22_v1 = vld [vmem:[#allocation2 + $0x8] sm:$0xff]  ;;  %v331_v26 = vmov 683565275  }
  0x13   :  { %v360_v2 = vmul.f32 30.0, %v21_v0  ;;  %v362_v3 = vmul.f32 30.0, %v22_v1  ;;  %v332_v28 = vmov 2475754826   ;;  %v333_v30 = vmov 2131351028  }
  0x14   :  { %v334_v32 = vmov 2102212464   ;;  %v335_v34 = vmov 920167782   ;;  %v336_v42 = vmov 1326507024  }
  0x15   :  { %v25_v4 = vand.u32 2147483647, %v360_v2  ;;  %v28_v5 = vand.u32 2139095040, %v360_v2  ;;  %v129_v6 = vand.u32 2147483647, %v362_v3  ;;  %v132_v7 = vand.u32 2139095040, %v362_v3 }
  0x16   :  { %vm27_vm14 = vcmp.lt.s32.totalorder %v360_v2, 0  ;;  %s337_s0 = smov [#allocation5]  }
  0x17   :  { %v29_v8 = vshrl.u32 %v28_v5, 23  ;;  %v32_v9 = vand.u32 8388607, %v25_v4  ;;  %v133_v10 = vshrl.u32 %v132_v7, 23  ;;  %v136_v11 = vand.u32 8388607, %v129_v6 }
  0x18   :  { %vm26_vm15 = vcmp.le.f32.partialorder %v25_v4, 0.7853982  ;;  %s241_s18 = sshll.u32 %s337_s0, 4  ;;  %s242_s18 = int_to_ptr.vmem [resolvable:$true] %s241_s18 }
  0x19   :  { %v250_v12 = vadd.s32 4294967169, %v29_v8  ;;  %v254_v13 = vadd.s32 4294967169, %v133_v10  ;;  %v33_v15 = vor.u32 8388608, %v32_v9  ;;  %v137_v16 = vor.u32 8388608, %v136_v11  ;;  %s304_s19 = scalar_lea.vmem %s242_s18, 256  ;;  %p309_p9 = scmp.lt.s32.totalorder %s242_s18, %s242_s18 }
  0x1a   :  { %p305_p8 = scmp.ne.s32.totalorder %s242_s18, %s304_s19  ;;  %p310_p10 = scmp.lt.s32.totalorder %s304_s19, %s304_s19 }
  0x1b   :  { %v35_v14 = vadd.s32 1, %v250_v12  ;;  %v139_v17 = vadd.s32 1, %v254_v13  ;;  %v372_v22 = vshll.u32 %v33_v15, 8  ;;  %v374_v24 = vshll.u32 %v137_v16, 8 }
  0x1c   :  { %p311_p11 = por %p310_p10, %p309_p9 }
  0x1d   :  { %vm36_vm0 = vcmp.gt.s32.totalorder %v35_v14, 0  ;;  %vm140_vm1 = vcmp.gt.s32.totalorder %v139_v17, 0 }
  0x1e   :  { %v37_v18 = vsel %vm36_vm0, %v35_v14, 0  ;;  %v141_v21 = vsel %vm140_vm1, %v139_v17, 0  ;;  %vm131_vm0 = vcmp.lt.s32.totalorder %v362_v3, 0  ;;  %vm130_vm1 = vcmp.le.f32.partialorder %v129_v6, 0.7853982  ;;  %p312_p12 = pnand %p311_p11, %p305_p8 }
  0x1f   :  { %v38_v19 = vshrl.u32 %v37_v18, 5  ;;  %v39_v20 = vand.u32 31, %v37_v18  ;;  %v143_v23 = vand.u32 31, %v141_v21  ;;  %v376_v36 = vshrl.u32 %v141_v21, 5 }
  0x21   :  { %v40_v25 = vsub.s32 32, %v39_v20  ;;  %v42_v27 = vshll.u32 %v331_v26, %v39_v20  ;;  %v45_v29 = vshll.u32 %v332_v28, %v39_v20  ;;  %v48_v31 = vshll.u32 %v333_v30, %v39_v20 }
  0x22   :  { %v51_v33 = vshll.u32 %v334_v32, %v39_v20  ;;  %v54_v35 = vshll.u32 %v335_v34, %v39_v20  ;;  %vm57_vm2 = vcmp.lt.s32.totalorder %v38_v19, 1  ;;  %vm58_vm3 = vcmp.lt.s32.totalorder %v38_v19, 2 }
  0x23   :  { %v41_v37 = vshrl.u32 %v331_v26, %v40_v25  ;;  %v43_v38 = vshrl.u32 %v332_v28, %v40_v25  ;;  %v46_v39 = vshrl.u32 %v333_v30, %v40_v25  ;;  %v49_v40 = vshrl.u32 %v334_v32, %v40_v25 }
  0x24   :  { %v52_v41 = vshrl.u32 %v335_v34, %v40_v25  ;;  %v55_v43 = vshrl.u32 %v336_v42, %v40_v25  ;;  %vm60_vm4 = vcmp.lt.s32.totalorder %v38_v19, 4  ;;  %v144_v47 = vsub.s32 32, %v143_v23 }
  0x25   :  { %v44_v44 = vor.u32 %v43_v38, %v42_v27  ;;  %v47_v45 = vor.u32 %v46_v39, %v45_v29  ;;  %v50_v46 = vor.u32 %v49_v40, %v48_v31  ;;  %vm59_vm5 = vcmp.lt.s32.totalorder %v38_v19, 3 }
  0x26   :  { %v53_v48 = vor.u32 %v52_v41, %v51_v33  ;;  %v56_v49 = vor.u32 %v55_v43, %v54_v35  ;;  %v146_v50 = vshll.u32 %v331_v26, %v143_v23  ;;  %v149_v58 = vshll.u32 %v332_v28, %v143_v23 }
  0x27   :  { %v61_v51 = vsel %vm57_vm2, %v41_v37, %v44_v44  ;;  %v62_v52 = vsel %vm60_vm4, %v50_v46, 2102212464  ;;  %v65_v53 = vsel %vm57_vm2, %v44_v44, %v47_v45  ;;  %v69_v54 = vsel %vm57_vm2, %v47_v45, %v50_v46 }
  0x28   :  { %v63_v55 = vsel %vm59_vm5, %v47_v45, %v62_v52  ;;  %v66_v56 = vsel %vm60_vm4, %v53_v48, 920167782  ;;  %v70_v57 = vsel %vm60_vm4, %v56_v49, 1326507024  ;;  %v145_v61 = vshrl.u32 %v331_v26, %v144_v47 }
  0x29   :  { %v67_v59 = vsel %vm59_vm5, %v50_v46, %v66_v56  ;;  %v71_v60 = vsel %vm59_vm5, %v53_v48, %v70_v57  ;;  %v147_v62 = vshrl.u32 %v332_v28, %v144_v47  ;;  %v64_v63 = vsel %vm58_vm3, %v61_v51, %v63_v55 }
  0x2a   :  { %v68_v0 = vsel %vm58_vm3, %v65_v53, %v67_v59  ;;  %v72_v1 = vsel %vm58_vm3, %v69_v54, %v71_v60  ;;  %v150_v5 = vshrl.u32 %v333_v30, %v144_v47  ;;  %v152_v13 = vshll.u32 %v333_v30, %v143_v23 }
  0x2b   :  { %v385_v7 = vmul.u32.u64.low %v372_v22, %v72_v1  ;;  %v386_v8 = vmul.u32.u64.high %v372_v22, %v72_v1, %v385_v7  ;;  %v389_v9 = vmul.u32.u64.low %v372_v22, %v68_v0  ;;  %v390_v10 = vmul.u32.u64.high %v372_v22, %v68_v0, %v389_v9 }
  0x2c   :  { %v148_v11 = vor.u32 %v147_v62, %v146_v50  ;;  %v151_v12 = vor.u32 %v150_v5, %v149_v58  ;;  %v153_v14 = vshrl.u32 %v334_v32, %v144_v47  ;;  %v155_v15 = vshll.u32 %v334_v32, %v143_v23 }
  0x2d   :  { %v156_v16 = vshrl.u32 %v335_v34, %v144_v47  ;;  %v158_v17 = vshll.u32 %v335_v34, %v143_v23  ;;  %v159_v18 = vshrl.u32 %v336_v42, %v144_v47  ;;  %v80_v19 = vmul.u32 %v372_v22, %v64_v63 }
  0x2e   :  { %v154_v20 = vor.u32 %v153_v14, %v152_v13  ;;  %vm161_vm6 = vcmp.lt.s32.totalorder %v376_v36, 1  ;;  %vm162_vm7 = vcmp.lt.s32.totalorder %v376_v36, 2  ;;  %vm82_vm8 = vc.u32 %v386_v8, %v389_v9 }
  0x2f   :  { %v83_v21 = vadd.s32 1, %v390_v10  ;;  %v157_v25 = vor.u32 %v156_v16, %v155_v15  ;;  %vm163_vm9 = vcmp.lt.s32.totalorder %v376_v36, 3  ;;  %v160_v26 = vor.u32 %v159_v18, %v158_v17 }
  0x30   :  { %vm164_vm10 = vcmp.lt.s32.totalorder %v376_v36, 4  ;;  %v165_v27 = vsel %vm161_vm6, %v145_v61, %v148_v11  ;;  %v169_v23 = vsel %vm161_vm6, %v148_v11, %v151_v12  ;;  %v173_v30 = vsel %vm161_vm6, %v151_v12, %v154_v20 }
  0x31   :  { %v84_v28 = vsel %vm82_vm8, %v83_v21, %v390_v10  ;;  %v166_v22 = vsel %vm164_vm10, %v154_v20, 2102212464  ;;  %v170_v29 = vsel %vm164_vm10, %v157_v25, 920167782  ;;  %v174_v34 = vsel %vm164_vm10, %v160_v26, 1326507024 }
  0x32   :  { %v85_v31 = vadd.s32 %v84_v28, %v80_v19  ;;  %v167_v32 = vsel %vm163_vm9, %v151_v12, %v166_v22  ;;  %v171_v33 = vsel %vm163_vm9, %v154_v20, %v170_v29  ;;  %v175_v38 = vsel %vm163_vm9, %v157_v25, %v174_v34 }
  0x33   :  { %v168_v35 = vsel %vm162_vm7, %v165_v27, %v167_v32  ;;  %v172_v37 = vsel %vm162_vm7, %v169_v23, %v171_v33  ;;  %v176_v40 = vsel %vm162_vm7, %v173_v30, %v175_v38  ;;  %v81_v59 = vadd.s32 %v389_v9, %v386_v8 }
  0x34   :  { %v86_v39 = vadd.s32 536870912, %v85_v31  ;;  %v407_v41 = vmul.u32.u64.low %v374_v24, %v172_v37  ;;  %v408_v42 = vmul.u32.u64.high %v374_v24, %v172_v37, %v407_v41  ;;  %v184_v46 = vmul.u32 %v374_v24, %v168_v35 }
  0x35   :  { %v411_v43 = vmul.u32.u64.low %v374_v24, %v176_v40  ;;  %v412_v44 = vmul.u32.u64.high %v374_v24, %v176_v40, %v411_v43  ;;  %vm117_vm5 = vweird.f32 %v360_v2  ;;  %vm221_vm9 = vweird.f32 %v362_v3 }
  0x36   :  { %v87_v45 = vshrl.u32 %v86_v39, 30  ;;  %v187_v48 = vadd.s32 1, %v408_v42 }
  0x37   :  { %vm186_vm11 = vc.u32 %v412_v44, %v407_v41  ;;  %v185_v15 = vadd.s32 %v407_v41, %v412_v44 }
  0x38   :  { %v88_v47 = vshll.u32 %v87_v45, 30  ;;  %v188_v36 = vsel %vm186_vm11, %v187_v48, %v408_v42  ;;  %v111_v8 = vsub.s32 4, %v87_v45 }
  0x39   :  { %v189_v50 = vadd.s32 %v188_v36, %v184_v46 }
  0x3a   :  { %v89_v49 = vsub.s32 %v85_v31, %v88_v47  ;;  %v112_v27 = vsel %vm27_vm14, %v111_v8, %v87_v45 }
  0x3b   :  { %v190_v52 = vadd.s32 536870912, %v189_v50  ;;  %v114_v30 = vsel %vm26_vm15, 0, %v112_v27 }
  0x3c   :  { %v91_v51 = vsub.s32 0, %v89_v49  ;;  %v118_v35 = vadd.s32 3, %v114_v30 }
  0x3d   :  { %v191_v54 = vshrl.u32 %v190_v52, 30 }
  0x3e   :  { %v251_v53 = vmin.u32 %v91_v51, %v89_v49  ;;  %v119_v39 = vand.u32 3, %v118_v35 }
  0x3f   :  { %v192_v56 = vshll.u32 %v191_v54, 30  ;;  %v215_v34 = vsub.s32 4, %v191_v54 }
  0x40   :  { %v93_v55 = vclz %v251_v53  ;;  %vm124_vm2 = vcmp.eq.s32.totalorder %v119_v39, 2  ;;  %vm121_vm3 = vcmp.eq.s32.totalorder %v119_v39, 0  ;;  %vm120_vm4 = vcmp.lt.s32.totalorder %v119_v39, 2 }
  0x41   :  { %v193_v58 = vsub.s32 %v189_v50, %v192_v56  ;;  %v216_v38 = vsel %vm131_vm0, %v215_v34, %v191_v54 }
  0x42   :  { %v252_v57 = vadd.s32 4294967294, %v93_v55  ;;  %v218_v42 = vsel %vm130_vm1, 0, %v216_v38 }
  0x43   :  { %v195_v60 = vsub.s32 0, %v193_v58  ;;  %v222_v46 = vadd.s32 3, %v218_v42 }
  0x44   :  { %vm253_vm12 = vcmp.lt.s32.totalorder %v252_v57, 0 }
  0x45   :  { %v96_v24 = vsel %vm253_vm12, 0, %v252_v57  ;;  %v255_v0 = vmin.u32 %v195_v60, %v193_v58  ;;  %v223_v36 = vand.u32 3, %v222_v46 }
  0x46   :  { %v97_v61 = vsub.s32 32, %v96_v24  ;;  %v98_v62 = vshll.u32 %v89_v49, %v96_v24  ;;  %v101_v63 = vsub.s32 4294967266, %v96_v24 }
  0x47   :  { %v197_v7 = vclz %v255_v0  ;;  %vm228_vm6 = vcmp.eq.s32.totalorder %v223_v36, 2  ;;  %vm225_vm7 = vcmp.eq.s32.totalorder %v223_v36, 0  ;;  %vm224_vm8 = vcmp.lt.s32.totalorder %v223_v36, 2 }
  0x48   :  { %v99_v1 = vshrl.u32 %v81_v59, %v97_v61  ;;  %v102_v5 = vadd.s32 127, %v101_v63 }
  0x49   :  { %v256_v12 = vadd.s32 4294967294, %v197_v7 }
  0x4a   :  { %v100_v10 = vor.u32 %v99_v1, %v98_v62  ;;  %v103_v11 = vshll.u32 %v102_v5, 23 }
  0x4b   :  { %vm257_vm13 = vcmp.lt.s32.totalorder %v256_v12, 0 }
  0x4c   :  { %v104_v13 = vor.u32 4788187, %v103_v11  ;;  %v107_v14 = vcvt.s32.f32 %v100_v10  ;;  %v200_v9 = vsel %vm257_vm13, 0, %v256_v12 }
  0x4d   :  { %v201_v17 = vsub.s32 32, %v200_v9  ;;  %v202_v18 = vshll.u32 %v193_v58, %v200_v9  ;;  %v205_v19 = vsub.s32 4294967266, %v200_v9 }
  0x4e   :  { %v105_v16 = vand.u32 2147483647, %v104_v13 }
  0x4f   :  { %v203_v21 = vshrl.u32 %v185_v15, %v201_v17  ;;  %v206_v25 = vadd.s32 127, %v205_v19 }
  0x50   :  { %v108_v20 = vmul.f32 %v107_v14, %v105_v16 }
  0x51   :  { %v204_v23 = vor.u32 %v203_v21, %v202_v18  ;;  %v207_v28 = vshll.u32 %v206_v25, 23 }
  0x52   :  { %v109_v26 = vxor.u32 2147483648, %v108_v20 }
  0x53   :  { %v208_v31 = vor.u32 4788187, %v207_v28  ;;  %v211_v32 = vcvt.s32.f32 %v204_v23 }
  0x54   :  { %v110_v22 = vsel %vm27_vm14, %v109_v26, %v108_v20 }
  0x55   :  { %v113_v29 = vsel %vm26_vm15, %v360_v2, %v110_v22  ;;  %v209_v33 = vand.u32 2147483647, %v208_v31 }
  0x56   :  { %274 = vcosq.f32 %v113_v29 }
  0x57   :  { %276 = vsinq.f32 %v113_v29  ;;  %v212_v37 = vmul.f32 %v211_v32, %v209_v33 }
  0x59   :  { %v213_v4 = vxor.u32 2147483648, %v212_v37 }
  0x5b   :  { %v214_v40 = vsel %vm131_vm0, %v213_v4, %v212_v37 }
  0x5c   :  { %v217_v41 = vsel %vm130_vm1, %v362_v3, %v214_v40 }
  0x5d   :  { %278 = vcosq.f32 %v217_v41 }
  0x5e   :  { %280 = vsinq.f32 %v217_v41 }
  0x60   :  { %v275_v43 = vpop.eup %274 }
  0x61   :  { %v277_v44 = vpop.eup %276  ;;  %v125_v45 = vxor.u32 2147483648, %v275_v43 }
  0x62   :  { %v122_v47 = vxor.u32 2147483648, %v277_v44 }
  0x63   :  { %v126_v6 = vsel %vm124_vm2, %v125_v45, %v277_v44 }
  0x64   :  { %v123_v48 = vsel %vm121_vm3, %v275_v43, %v122_v47 }
  0x65   :  { %v127_v49 = vsel %vm120_vm4, %v123_v48, %v126_v6 }
  0x66   :  { %v128_v50 = vsel %vm117_vm5, nan, %v127_v49 }
  0x67   :  { %233 = vst [vmem:[#allocation5] sm:$0xff] %v128_v50  ;;  %v279_v51 = vpop.eup %278 }
  0x68   :  { %v281_v52 = vpop.eup %280  ;;  %v229_v53 = vxor.u32 2147483648, %v279_v51 }
  0x69   :  { %v226_v54 = vxor.u32 2147483648, %v281_v52 }
  0x6a   :  { %v230_v55 = vsel %vm228_vm6, %v229_v53, %v281_v52 }
  0x6b   :  { %v227_v56 = vsel %vm225_vm7, %v279_v51, %v226_v54 }
  0x6c   :  { %v231_v2 = vsel %vm224_vm8, %v227_v56, %v230_v55 }
  0x6d   :  { %v232_v57 = vsel %vm221_vm9, nan, %v231_v2 }
  0x6e   :  { %234 = vst [vmem:[#allocation5 + $0x8] sm:$0xff] %v232_v57 }
  0x6f   :  { %315 = shalt.err (!%p312_p12)
}
  0x70   :  { %s316_s22 = scalar_lea.hbm %s443_s1, 256 }
  0x71   :  { %p317_p13 = scmp.ne.s32.totalorder %s443_s1, %s316_s22  ;;  %p320_p0 = scmp.lt.u32.totalorder %s316_s22, %s443_s1 }
  0x73   :  { %p322_p1 = pnand %p320_p0, %p317_p13 }
  0x75   :  { %325 = shalt.err (!%p322_p1)
}
  0x76   :  { %244 = dma.vmem_to_hbm [thread:$0]  %s242_s18, 256, %s443_s1, [#allocation4]  }
  0x77   :  { %328 = dma.done.wait [#allocation4], 256  }
  0x78   :  { %329 = vsyncadd [#allocation4], 4294967040 }
  0x79   :  { %248 = vsyncpa [#allocation3], 1 }
  0x7a   :  { %249 = vsyncpa [#allocation4], 1 }

</bundles_post_ra>
